<compile_context>
chip_gen: v7x
topology: tpu7x:2x2x1
jax: 0.10.0
libtpu: 0.0.40
codegen_flags: <defaults>
</compile_context>

<pallas_src>
import functools

import jax
import jax.numpy as jnp
from jax import lax
from jax.experimental import pallas as pl
from jax.experimental.pallas import tpu as pltpu


def _triplet_kernel(perm_ref,   # VMEM (B, 1) int32 — permutation for the negative sample
                    x_ref,      # VMEM (B, Hi+Ht)   — [cls_token | start_token]
                    w_ref,      # VMEM (Hi+Ht, 2P)  — block-diag(img_w.T, txt_w.T)
                    b_ref,      # VMEM (1, 2P)      — [img_b | txt_b]
                    out_ref):   # VMEM (3B, P)      — [anchor; positive; negative]
    B = x_ref.shape[0]
    P = out_ref.shape[1]

    # --- fused image+text projection: one MXU pass over the block-diagonal weight ------------
    y = jnp.dot(x_ref[...], w_ref[...],
                preferred_element_type=jnp.float32,
                precision=lax.Precision.HIGHEST) + b_ref[...]
    yi = y[:, :P]          # image projection  (B, P)  — lane-aligned split at P=128
    yt = y[:, P:]          # text  projection  (B, P)

    # --- L2 normalize (anchor = image, positive = text) ---------------------------------------
    inv_i = lax.rsqrt(jnp.maximum(jnp.sum(yi * yi, axis=-1, keepdims=True), 1e-24))
    inv_t = lax.rsqrt(jnp.maximum(jnp.sum(yt * yt, axis=-1, keepdims=True), 1e-24))
    anchor = yi * inv_i
    positive = yt * inv_t

    # --- negative = positive[perm]  (exact row gather via one-hot matmul, HIGHEST precision) --
    col_ids = lax.broadcasted_iota(jnp.int32, (B, B), 1)
    onehot = (col_ids == perm_ref[...]).astype(jnp.float32)      # (B,1) broadcast vs (B,B)
    negative = jnp.dot(onehot, positive,
                       preferred_element_type=jnp.float32,
                       precision=lax.Precision.HIGHEST)

    # --- single lane-dense writeback ----------------------------------------------------------
    out_ref[...] = jnp.concatenate([anchor, positive, negative], axis=0).astype(out_ref.dtype)


def _triplet_pallas(perm_idx, x_cat, w_cat, b_cat, proj_size):
    """Single fused launch producing a (3B, P) buffer: [anchor; positive; negative]."""
    B = x_cat.shape[0]
    Hc = x_cat.shape[1]
    P = proj_size
    vmem = pl.BlockSpec(memory_space=pltpu.MemorySpace.VMEM)
    in_bytes = 4 * (B * 1 + B * Hc + Hc * 2 * P + 2 * P)
    out_bytes = 4 * (3 * B * P)
    cost = pl.CostEstimate(
        flops=2 * B * Hc * 2 * P + 2 * B * B * P,
        bytes_accessed=in_bytes + out_bytes,
        transcendentals=2 * B,
    )
    return pl.pallas_call(
        _triplet_kernel,
        out_shape=jax.ShapeDtypeStruct((3 * B, P), jnp.float32),
        in_specs=[vmem, vmem, vmem, vmem],
        out_specs=vmem,
        cost_estimate=cost,
    )(perm_idx, x_cat, w_cat, b_cat)


@functools.partial(jax.jit, static_argnames=("proj_size",))
def triplet_forward(cls_token, start_token, w_cat, b_cat, perm_key, proj_size):
    """Jitted end-to-end forward: randperm + concat + fused kernel + slice."""
    B = cls_token.shape[0]
    perm_idx = jax.random.permutation(perm_key, B).astype(jnp.int32).reshape(B, 1)
    x_cat = jnp.concatenate([cls_token, start_token], axis=-1)
    out = _triplet_pallas(perm_idx, x_cat, w_cat, b_cat, proj_size)
    return out[0:B], out[B:2 * B], out[2 * B:3 * B]


class TripletHeadPallas:
    """Pallas port of TripletHead: two Linear projections + F.normalize + triplet outputs."""

    def __init__(self, img_hidden_size, text_hidden_size, projection_size, key):
        k1, k2, k3, k4 = jax.random.split(key, 4)
        # Deterministic synthetic init with nn.Linear's shapes: weight (out, in), bias (out,)
        bound_i = 1.0 / float(img_hidden_size) ** 0.5
        bound_t = 1.0 / float(text_hidden_size) ** 0.5
        img_w = jax.random.uniform(k1, (projection_size, img_hidden_size),
                                   jnp.float32, -bound_i, bound_i)
        img_b = jax.random.uniform(k2, (projection_size,), jnp.float32, -bound_i, bound_i)
        txt_w = jax.random.uniform(k3, (projection_size, text_hidden_size),
                                   jnp.float32, -bound_t, bound_t)
        txt_b = jax.random.uniform(k4, (projection_size,), jnp.float32, -bound_t, bound_t)

        self.proj_size = projection_size
        self.img_w_t = jnp.asarray(img_w.T)                 # (Hi, P)  (kept for reference check)
        self.txt_w_t = jnp.asarray(txt_w.T)                 # (Ht, P)
        self.img_b = jnp.asarray(img_b)
        self.txt_b = jnp.asarray(txt_b)

        # Block-diagonal fused weight / concatenated bias, built once.
        Hi, Ht, P = img_hidden_size, text_hidden_size, projection_size
        w_cat = jnp.zeros((Hi + Ht, 2 * P), jnp.float32)
        w_cat = w_cat.at[:Hi, :P].set(self.img_w_t)
        w_cat = w_cat.at[Hi:, P:].set(self.txt_w_t)
        self.w_cat = w_cat                                  # (Hi+Ht, 2P)
        self.b_cat = jnp.concatenate([img_b, txt_b]).reshape(1, 2 * P)

    def __call__(self, cls_token, start_token, perm_key):
        return triplet_forward(cls_token, start_token, self.w_cat, self.b_cat,
                               perm_key, self.proj_size)


if __name__ == "__main__":
    B = 8        # multiple of 8 -> full sublane tiles
    IMG_H = 32
    TXT_H = 48
    PROJ = 128   # multiple of 128 -> lane-dense, unmasked stores

    root = jax.random.PRNGKey(0)
    k_params, k_img, k_txt, k_perm = jax.random.split(root, 4)

    head = TripletHeadPallas(IMG_H, TXT_H, PROJ, k_params)

    cls_token = jax.random.normal(k_img, (B, IMG_H), jnp.float32)
    start_token = jax.random.normal(k_txt, (B, TXT_H), jnp.float32)

    anchor, positive, negative = head(cls_token, start_token, k_perm)
    jax.block_until_ready((anchor, positive, negative))

    # --- sanity checks against a pure-JAX reference --------------------------------------------
    assert anchor.shape == (B, PROJ) and positive.shape == (B, PROJ) and negative.shape == (B, PROJ)

    def ref_proj_norm(x, w_t, b):
        y = jnp.dot(x, w_t, precision=lax.Precision.HIGHEST) + b.reshape(1, -1)
        n = jnp.linalg.norm(y, axis=-1, keepdims=True)
        return y / jnp.maximum(n, 1e-12)

    ref_anchor = ref_proj_norm(cls_token, head.img_w_t, head.img_b)
    ref_positive = ref_proj_norm(start_token, head.txt_w_t, head.txt_b)
    perm = jax.random.permutation(k_perm, B).astype(jnp.int32)
    ref_negative = ref_positive[perm]

    assert jnp.allclose(jnp.linalg.norm(anchor, axis=-1), 1.0, atol=1e-4)
    assert jnp.allclose(jnp.linalg.norm(positive, axis=-1), 1.0, atol=1e-4)
    assert jnp.allclose(jnp.linalg.norm(negative, axis=-1), 1.0, atol=1e-4)
    assert jnp.allclose(anchor, ref_anchor, atol=1e-5)
    assert jnp.allclose(positive, ref_positive, atol=1e-5)
    assert jnp.allclose(negative, ref_negative, atol=1e-5)

    print("KERNEL_OK")
</pallas_src>

<mosaic_0001>
module attributes {stable_mosaic.version = 11 : i64} {
  func.func @_triplet_kernel(%arg0: memref<8x1xi32, #tpu.memory_space<vmem>>, %arg1: memref<8x80xf32, #tpu.memory_space<vmem>>, %arg2: memref<80x256xf32, #tpu.memory_space<vmem>>, %arg3: memref<1x256xf32, #tpu.memory_space<vmem>>, %arg4: memref<24x128xf32, #tpu.memory_space<vmem>>) attributes {dimension_semantics = [], scalar_prefetch = 0 : i64, scratch_operands = 0 : i64, tpu.core_type = #tpu.core_type<tc>} {
    %c0 = arith.constant 0 : index
    %c0_0 = arith.constant 0 : index
    %0 = vector.load %arg1[%c0, %c0_0] : memref<8x80xf32, #tpu.memory_space<vmem>>, vector<8x80xf32>
    %c0_1 = arith.constant 0 : index
    %c0_2 = arith.constant 0 : index
    %1 = vector.load %arg2[%c0_1, %c0_2] : memref<80x256xf32, #tpu.memory_space<vmem>>, vector<80x256xf32>
    %cst = arith.constant dense<0.000000e+00> : vector<8x256xf32>
    %2 = tpu.matmul %0, %1, %cst {dimension_numbers = #tpu.dot_dimension_numbers<[1], [0], [0], [1], [0, 0, 1, 1], [], []>, precision = #tpu.contract_precision<fp32>} : vector<8x80xf32>, vector<80x256xf32>, vector<8x256xf32> -> vector<8x256xf32>
    %c0_3 = arith.constant 0 : index
    %c0_4 = arith.constant 0 : index
    %3 = vector.load %arg3[%c0_3, %c0_4] : memref<1x256xf32, #tpu.memory_space<vmem>>, vector<1x256xf32>
    %4 = vector.broadcast %3 : vector<1x256xf32> to vector<8x256xf32>
    %5 = arith.addf %2, %4 : vector<8x256xf32>
    %6 = vector.extract_strided_slice %5 {offsets = [0, 0], sizes = [8, 128], strides = [1, 1]} : vector<8x256xf32> to vector<8x128xf32>
    %7 = vector.extract_strided_slice %5 {offsets = [0, 128], sizes = [8, 128], strides = [1, 1]} : vector<8x256xf32> to vector<8x128xf32>
    %8 = arith.mulf %6, %6 : vector<8x128xf32>
    %cst_5 = arith.constant dense<0.000000e+00> : vector<8xf32>
    %9 = vector.multi_reduction <add>, %8, %cst_5 [1] : vector<8x128xf32> to vector<8xf32>
    %10 = vector.shape_cast %9 : vector<8xf32> to vector<8x1xf32>
    %cst_6 = arith.constant 1.000000e-24 : f32
    %11 = vector.broadcast %cst_6 : f32 to vector<8x1xf32>
    %12 = arith.maximumf %10, %11 : vector<8x1xf32>
    %13 = math.rsqrt %12 : vector<8x1xf32>
    %14 = arith.mulf %7, %7 : vector<8x128xf32>
    %cst_7 = arith.constant dense<0.000000e+00> : vector<8xf32>
    %15 = vector.multi_reduction <add>, %14, %cst_7 [1] : vector<8x128xf32> to vector<8xf32>
    %16 = vector.shape_cast %15 : vector<8xf32> to vector<8x1xf32>
    %cst_8 = arith.constant 1.000000e-24 : f32
    %17 = vector.broadcast %cst_8 : f32 to vector<8x1xf32>
    %18 = arith.maximumf %16, %17 : vector<8x1xf32>
    %19 = math.rsqrt %18 : vector<8x1xf32>
    %20 = vector.broadcast %13 : vector<8x1xf32> to vector<8x128xf32>
    %21 = arith.mulf %6, %20 : vector<8x128xf32>
    %22 = vector.broadcast %19 : vector<8x1xf32> to vector<8x128xf32>
    %23 = arith.mulf %7, %22 : vector<8x128xf32>
    %24 = tpu.iota {dimensions = array<i32: 1>} : vector<8x8xi32>
    %c0_9 = arith.constant 0 : index
    %c0_10 = arith.constant 0 : index
    %25 = vector.load %arg0[%c0_9, %c0_10] : memref<8x1xi32, #tpu.memory_space<vmem>>, vector<8x1xi32>
    %26 = vector.broadcast %25 : vector<8x1xi32> to vector<8x8xi32>
    %27 = arith.cmpi eq, %24, %26 : vector<8x8xi32>
    %28 = arith.extui %27 : vector<8x8xi1> to vector<8x8xi32>
    %29 = arith.sitofp %28 : vector<8x8xi32> to vector<8x8xf32>
    %cst_11 = arith.constant dense<0.000000e+00> : vector<8x128xf32>
    %30 = tpu.matmul %29, %23, %cst_11 {dimension_numbers = #tpu.dot_dimension_numbers<[1], [0], [0], [1], [0, 0, 1, 1], [], []>, precision = #tpu.contract_precision<fp32>} : vector<8x8xf32>, vector<8x128xf32>, vector<8x128xf32> -> vector<8x128xf32>
    %31 = tpu.concatenate %21, %23, %30 in 0 : vector<8x128xf32>, vector<8x128xf32>, vector<8x128xf32> -> vector<24x128xf32>
    %c0_12 = arith.constant 0 : index
    %c0_13 = arith.constant 0 : index
    %32 = vector.load %arg4[%c0_12, %c0_13] : memref<24x128xf32, #tpu.memory_space<vmem>>, vector<24x128xf32>
    tpu.vector_store %arg4[%c0_12, %c0_13], %31 {strides = array<i32>} : memref<24x128xf32, #tpu.memory_space<vmem>>, vector<24x128xf32>,
    return
  }
}

</mosaic_0001>

<bundles_post_ra>
// kernel: triplet_forward.1
= control target key start
LH: loop header
LB: loop body
LE: loop exit
PB: predicated region body
PF: predicated region fallthrough
CT: control target
= control target key end

     0   :  { %9 = vsyncpa [#allocation3], 0  ;;  %s1469_s15 = smov [#allocation2]   ;;  %s1897_s0 = inlined_call_operand.vmem [shape: s32[8,1], index: 0, kind: input, shape index: {}]   ;;  %s1898_s1 = inlined_call_operand.vmem [shape: f32[8,80], index: 1, kind: input, shape index: {}]   ;;  %s1899_s2 = inlined_call_operand.hbm [shape: f32[80,256], index: 2, kind: input, shape index: {}]   ;;  %s1900_s3 = inlined_call_operand.vmem [shape: f32[1,256], index: 3, kind: input, shape index: {}]   ;;  %s1901_s4 = inlined_call_operand.vmem [shape: f32[24,128], index: 4, kind: output, shape index: {}]  }
   0x1   :  { %s19_s16 = sshll.u32 %s1469_s15, 4  ;;  %s1445_s19 = scalar_lea.hbm %s1899_s2, 2560  ;;  %s20_s16 = int_to_ptr.vmem [resolvable:$true] %s19_s16 }
   0x2   :  { %p1446_p0 = scmp.ne.s32.totalorder %s1899_s2, %s1445_s19  ;;  %p1449_p1 = scmp.lt.u32.totalorder %s1445_s19, %s1899_s2 }
   0x4   :  { %p1451_p2 = pnand %p1449_p1, %p1446_p0 }
   0x6   :  { %1454 = shalt.err (!%p1451_p2)
}
   0x7   :  { %s1455_s24 = scalar_lea.vmem %s20_s16, 2560  ;;  %p1460_p4 = scmp.lt.s32.totalorder %s20_s16, %s20_s16 }
   0x8   :  { %p1456_p3 = scmp.ne.s32.totalorder %s20_s16, %s1455_s24  ;;  %p1461_p5 = scmp.lt.s32.totalorder %s1455_s24, %s1455_s24 }
   0xa   :  { %p1462_p6 = por %p1461_p5, %p1460_p4 }
   0xc   :  { %p1463_p7 = pnand %p1462_p6, %p1456_p3 }
   0xe   :  { %1466 = shalt.err (!%p1463_p7)
}
   0xf   :  { %s1470_s25 = smov 256   ;;  %s1471_s26 = smov 16  }
  0x10   :  { %25 = dma.hbm_to_vmem [thread:$0]  %s1899_s2, 2560, %s20_s16, [#allocation3], %s1470_s25, %s1470_s25, %s1471_s26  }
  0x11   :  { %1467 = dma.done.wait [#allocation3], 2560  }
  0x12   :  { %1468 = vsyncadd [#allocation3], 4294964736  ;;  %v1472_v0 = vmov 0.0   ;;  %v1514_v1 = vld [vmem:[#allocation2 + $0x8] sm:$0xff]  ;;  %v1516_v2 = vld [vmem:[#allocation2 + $0x18] sm:$0xff]  ;;  %vm64_vm0 = vcmask 654336  }
  0x13   :  { %440 = vmatprep.mubr.f32.mxu0 %v1472_v0  ;;  %152 = vmatprep.mubr.f32.mxu1 %v1472_v0  ;;  %v1518_v3 = vld [vmem:[#allocation2] sm:$0xff]  ;;  %v68_v4 = vand.u32 4294901760, %v1514_v1  ;;  %v72_v5 = vand.u32 4294901760, %v1516_v2  ;;  %v1522_v6 = vld [vmem:[#allocation2 + $0x10] sm:$0xff]  ;;  %v1525_v8 = vld [vmem:[#allocation2 + $0x28] sm:$0xff]  ;;  %vm1474_vm1 = vmmov 0  }
  0x14   :  { %v70_v7 = vand.u32 4294901760, %v1518_v3  ;;  %v1527_v9 = vld [vmem:[#allocation2 + $0x38] sm:$0xff]  ;;  %v74_v10 = vand.u32 4294901760, %v1522_v6  ;;  %v76_v11 = vand.u32 4294901760, %v1525_v8  ;;  %v1532_v13 = vld [vmem:[#allocation2 + $0x20] sm:$0xff]  ;;  %v1534_v14 = vld [vmem:[#allocation2 + $0x30] sm:$0xff] }
  0x15   :  { %v80_v12 = vand.u32 4294901760, %v1527_v9  ;;  %v1536_v15 = vld [vmem:[#allocation2 + $0x48] sm:$0xff]  ;;  %v1541_v16 = vsub.f32 %v1514_v1, %v68_v4  ;;  %v1546_v17 = vsub.f32 %v1516_v2, %v72_v5  ;;  %v78_v19 = vand.u32 4294901760, %v1532_v13  ;;  %v1570_v24 = vld [vmem:[#allocation2 + $0x58] sm:$0xff]  ;;  %v1572_v25 = vld [vmem:[#allocation2 + $0x40] sm:$0xff] }
  0x16   :  { %v1551_v18 = vsub.f32 %v1518_v3, %v70_v7  ;;  %v1557_v20 = vsub.f32 %v1522_v6, %v74_v10  ;;  %v1562_v21 = vsub.f32 %v1525_v8, %v76_v11  ;;  %v82_v23 = vand.u32 4294901760, %v1534_v14  ;;  %v1574_v26 = vld [vmem:[#allocation2 + $0x50] sm:$0xff]  ;;  %v1584_v30 = vld [vmem:[#allocation2 + $0x68] sm:$0xff]  ;;  %v1586_v31 = vld [vmem:[#allocation2 + $0x78] sm:$0xff] }
  0x17   :  { %v1567_v22 = vsub.f32 %v1527_v9, %v80_v12  ;;  %v1332_v27 = vpack.c.bf16 %v1546_v17, %v1541_v16  ;;  %v1581_v28 = vsub.f32 %v1532_v13, %v78_v19  ;;  %v84_v29 = vand.u32 4294901760, %v1536_v15  ;;  %v1588_v32 = vld [vmem:[#allocation2 + $0x60] sm:$0xff]  ;;  %v1597_v36 = vld [vmem:[#allocation2 + $0x70] sm:$0xff]  ;;  %v1605_v41 = vld [vmem:[#allocation2 + $0x88] sm:$0xff] }
  0x18   :  { %v1334_v33 = vpack.c.bf16 %v1557_v20, %v1551_v18  ;;  %v1595_v35 = vsub.f32 %v1534_v14, %v82_v23  ;;  %v88_v37 = vand.u32 4294901760, %v1570_v24  ;;  %v86_v39 = vand.u32 4294901760, %v1572_v25  ;;  %v1612_v46 = vld [vmem:[#allocation2 + $0x98] sm:$0xff]  ;;  %v1624_v51 = vld [vmem:[#allocation2 + $0x80] sm:$0xff]  ;;  %v1626_v52 = vld [vmem:[#allocation2 + $0x90] sm:$0xff] }
  0x19   :  { %v1336_v34 = vpack.c.bf16 %v1567_v22, %v1562_v21  ;;  %1333 = vmatprep.subr.bf16.mxu0 %v1332_v27  ;;  %v1601_v38 = vsub.f32 %v1536_v15, %v84_v29  ;;  %v90_v40 = vand.u32 4294901760, %v1574_v26  ;;  %v92_v43 = vand.u32 4294901760, %v1584_v30  ;;  %v31_v60 = vld [vmem:[%s1898_s1] sm:$0xff] }
  0x1a   :  { %1335 = vmatpush1.bf16.msra.mxu0 %v1334_v33  ;;  %v1338_v42 = vpack.c.bf16 %v1595_v35, %v1581_v28  ;;  %v96_v44 = vand.u32 4294901760, %v1586_v31  ;;  %v94_v45 = vand.u32 4294901760, %v1588_v32  ;;  %v1615_v47 = vsub.f32 %v1570_v24, %v88_v37 }
  0x1b   :  { %1337 = vmatprep.subr.bf16.mxu0 %v1336_v34  ;;  %v1618_v48 = vsub.f32 %v1572_v25, %v86_v39  ;;  %v1621_v49 = vsub.f32 %v1574_v26, %v90_v40  ;;  %v98_v50 = vand.u32 4294901760, %v1597_v36  ;;  %v1629_v53 = vsub.f32 %v1584_v30, %v92_v43 }
  0x1c   :  { %v1632_v54 = vsub.f32 %v1586_v31, %v96_v44  ;;  %v100_v55 = vand.u32 4294901760, %v1605_v41  ;;  %v1340_v56 = vpack.c.bf16 %v1615_v47, %v1601_v38  ;;  %v1638_v57 = vsub.f32 %v1588_v32, %v94_v45 }
  0x1d   :  { %v1641_v58 = vsub.f32 %v1597_v36, %v98_v50  ;;  %v104_v59 = vand.u32 4294901760, %v1612_v46  ;;  %v1342_v61 = vpack.c.bf16 %v1621_v49, %v1618_v48  ;;  %v102_v63 = vand.u32 4294901760, %v1624_v51 }
  0x1e   :  { %1339 = vmatpush1.bf16.msra.mxu0 %v1338_v42  ;;  %v1344_v62 = vpack.c.bf16 %v1632_v54, %v1629_v53  ;;  %v106_v14 = vand.u32 4294901760, %v1626_v52  ;;  %v1654_v15 = vsub.f32 %v1605_v41, %v100_v55  ;;  %v1663_v25 = vpack.c.bf16 %v72_v5, %v68_v4 }
  0x1f   :  { %1341 = vmatprep.subr.bf16.mxu0 %v1340_v56  ;;  %v1657_v24 = vsub.f32 %v1612_v46, %v104_v59  ;;  %v1669_v26 = vpack.c.bf16 %v74_v10, %v70_v7  ;;  %v66_v27 = vsel %vm64_vm0, %v31_v60, 0  ;;  %v1676_v30 = vpack.c.bf16 %v80_v12, %v76_v11 }
  0x20   :  { %v1346_v1 = vpack.c.bf16 %v1641_v58, %v1638_v57  ;;  %1293 = vmatprep.subr.bf16.mxu1 %v1663_v25  ;;  %v1682_v2 = vsub.f32 %v1624_v51, %v102_v63  ;;  %v1685_v3 = vsub.f32 %v1626_v52, %v106_v14  ;;  %v1688_v4 = vand.u32 4294901760, %v66_v27 }
  0x21   :  { %1295 = vmatpush1.bf16.msra.mxu1 %v1669_v26  ;;  %v1692_v5 = vpack.c.bf16 %v82_v23, %v78_v19  ;;  %v1348_v6 = vpack.c.bf16 %v1657_v24, %v1654_v15  ;;  %v1697_v7 = vpack.c.bf16 %v88_v37, %v84_v29  ;;  %v166_v8 = vand.u32 4294901760, %v1541_v16 }
  0x22   :  { %1343 = vmatpush1.bf16.msra.mxu0 %v1342_v61  ;;  %1297 = vmatprep.subr.bf16.mxu1 %v1676_v30  ;;  %v178_v9 = vand.u32 4294901760, %v1546_v17  ;;  %v172_v10 = vand.u32 4294901760, %v1551_v18  ;;  %v184_v11 = vand.u32 4294901760, %v1557_v20  ;;  %v1350_v12 = vpack.c.bf16 %v1685_v3, %v1682_v2 }
  0x23   :  { %1345 = vmatprep.subr.bf16.mxu0 %v1344_v62  ;;  %v1706_v13 = vsub.f32 %v66_v27, %v1688_v4  ;;  %v1709_v19 = vpack.c.bf16 %v90_v40, %v86_v39  ;;  %v190_v23 = vand.u32 4294901760, %v1562_v21  ;;  %v1713_v29 = vpack.c.bf16 %v96_v44, %v92_v43 }
  0x24   :  { %v167_v31 = vsub.f32 %v1541_v16, %v166_v8  ;;  %v179_v32 = vsub.f32 %v1546_v17, %v178_v9  ;;  %v202_v33 = vand.u32 4294901760, %v1567_v22  ;;  %v1905_v36 = vand.u32 4294901760, %v1581_v28 }
  0x25   :  { %1299 = vmatpush1.bf16.msra.mxu1 %v1692_v5  ;;  %v1906_v34 = vand.u32 4294901760, %v1706_v13  ;;  %v1904_v37 = vand.u32 4294901760, %v1595_v35  ;;  %v1725_v39 = vpack.c.bf16 %v98_v50, %v94_v45  ;;  %v173_v40 = vsub.f32 %v1551_v18, %v172_v10 }
  0x26   :  { %1347 = vmatpush1.bf16.msra.mxu0 %v1346_v1  ;;  %1301 = vmatprep.subr.bf16.mxu1 %v1697_v7  ;;  %v1903_v41 = vand.u32 4294901760, %v1601_v38  ;;  %v185_v42 = vsub.f32 %v1557_v20, %v184_v11  ;;  %v191_v43 = vsub.f32 %v1562_v21, %v190_v23  ;;  %v203_v44 = vsub.f32 %v1567_v22, %v202_v33 }
  0x27   :  { %1349 = vmatprep.subr.bf16.mxu0 %v1348_v6  ;;  %v1743_v45 = vpack.c.bf16 %v104_v59, %v100_v55  ;;  %v168_v46 = vand.u32 4294901760, %v167_v31  ;;  %v180_v50 = vand.u32 4294901760, %v179_v32  ;;  %v1902_v51 = vand.u32 4294901760, %v1615_v47 }
  0x28   :  { %v1746_v52 = vpack.c.bf16 %v106_v14, %v102_v63  ;;  %v156_v56 = vsub.f32 %v1706_v13, %v1906_v34  ;;  %v197_v60 = vsub.f32 %v1581_v28, %v1905_v36  ;;  %v209_v61 = vsub.f32 %v1595_v35, %v1904_v37 }
  0x29   :  { %1303 = vmatpush1.bf16.msra.mxu1 %v1709_v19  ;;  %v215_v55 = vsub.f32 %v1601_v38, %v1903_v41  ;;  %v227_v59 = vsub.f32 %v1615_v47, %v1902_v51  ;;  %v220_v62 = vand.u32 4294901760, %v1618_v48  ;;  %v232_v63 = vand.u32 4294901760, %v1621_v49 }
  0x2a   :  { %1351 = vmatpush1.bf16.msra.mxu0 %v1350_v12  ;;  %1305 = vmatprep.subr.bf16.mxu1 %v1713_v29  ;;  %v174_v14 = vand.u32 4294901760, %v173_v40  ;;  %v186_v27 = vand.u32 4294901760, %v185_v42  ;;  %v192_v1 = vand.u32 4294901760, %v191_v43  ;;  %v204_v6 = vand.u32 4294901760, %v203_v44 }
  0x2b   :  { %1353 = vmatprep.subr.bf16.mxu0 %v1663_v25  ;;  %v1312_v12 = vpack.c.bf16 %v180_v50, %v168_v46  ;;  %v1908_v31 = vand.u32 4294901760, %v1629_v53  ;;  %v1907_v32 = vand.u32 4294901760, %v1632_v54  ;;  %v157_v51 = vand.u32 4294901760, %v156_v56 }
  0x2c   :  { %v198_v41 = vand.u32 4294901760, %v197_v60  ;;  %v210_v37 = vand.u32 4294901760, %v209_v61  ;;  %v216_v36 = vand.u32 4294901760, %v215_v55  ;;  %v228_v34 = vand.u32 4294901760, %v227_v59 }
  0x2d   :  { %443 = vmatmul.mubr.f32.vlgmr.msra.gmra.mrb[0].mxu0 %v1706_v13  ;;  %1307 = vmatpush1.bf16.msra.mxu1 %v1725_v39  ;;  %v221_v40 = vsub.f32 %v1618_v48, %v220_v62  ;;  %v233_v42 = vsub.f32 %v1621_v49, %v232_v63  ;;  %v1314_v43 = vpack.c.bf16 %v186_v27, %v174_v14  ;;  %v244_v46 = vand.u32 4294901760, %v1638_v57 }
  0x2e   :  { %1355 = vmatpush1.bf16.msra.mxu0 %v1669_v26  ;;  %1309 = vmatprep.subr.bf16.mxu1 %v1743_v45  ;;  %v1316_v44 = vpack.c.bf16 %v204_v6, %v192_v1  ;;  %v1909_v50 = vand.u32 4294901760, %v1641_v58  ;;  %v239_v56 = vsub.f32 %v1629_v53, %v1908_v31  ;;  %v251_v60 = vsub.f32 %v1632_v54, %v1907_v32 }
  0x2f   :  { %1357 = vmatprep.subr.bf16.mxu0 %v1676_v30  ;;  %533 = vmatprep.mubr.f32.mxu0 %v1472_v0  ;;  %v262_v61 = vand.u32 4294901760, %v1654_v15  ;;  %v274_v55 = vand.u32 4294901760, %v1657_v24  ;;  %v1318_v59 = vpack.c.bf16 %v210_v37, %v198_v41  ;;  %v1320_v14 = vpack.c.bf16 %v228_v34, %v216_v36 }
  0x30   :  { %v222_v27 = vand.u32 4294901760, %v221_v40  ;;  %v234_v1 = vand.u32 4294901760, %v233_v42  ;;  %v245_v6 = vsub.f32 %v1638_v57, %v244_v46  ;;  %v268_v32 = vand.u32 4294901760, %v1682_v2 }
  0x31   :  { %1311 = vmatpush1.bf16.msra.mxu1 %v1746_v52  ;;  %v280_v31 = vand.u32 4294901760, %v1685_v3  ;;  %v240_v34 = vand.u32 4294901760, %v239_v56  ;;  %v252_v36 = vand.u32 4294901760, %v251_v60  ;;  %v263_v37 = vsub.f32 %v1654_v15, %v262_v61 }
  0x32   :  { %1359 = vmatpush1.bf16.msra.mxu0 %v1692_v5  ;;  %1313 = vmatprep.subr.bf16.mxu1 %v1312_v12  ;;  %v257_v12 = vsub.f32 %v1641_v58, %v1909_v50  ;;  %v275_v41 = vsub.f32 %v1657_v24, %v274_v55  ;;  %v246_v40 = vand.u32 4294901760, %v245_v6  ;;  %v1372_v15 = vpack.c.bf16 %v178_v9, %v166_v8 }
  0x33   :  { %1361 = vmatprep.subr.bf16.mxu0 %v1697_v7  ;;  %v281_v50 = vsub.f32 %v1685_v3, %v280_v31  ;;  %v1324_v24 = vpack.c.bf16 %v252_v36, %v240_v34  ;;  %v1376_v16 = vpack.c.bf16 %v202_v33, %v190_v23  ;;  %v1910_v8 = vand.u32 4294901760, %v1706_v13 }
  0x34   :  { %158 = vmatmul.mubr.f32.vlgmr.msra.gmra.mrb[0].mxu1 %v157_v51  ;;  %v1322_v51 = vpack.c.bf16 %v234_v1, %v222_v27  ;;  %v258_v42 = vand.u32 4294901760, %v257_v12  ;;  %v276_v56 = vand.u32 4294901760, %v275_v41  ;;  %v1911_v18 = vand.u32 4294901760, %v1581_v28 }
  0x35   :  { %1315 = vmatpush1.bf16.msra.mxu1 %v1314_v43  ;;  %328 = vmatprep.mubr.f32.mxu1 %v1472_v0  ;;  %v269_v43 = vsub.f32 %v1682_v2, %v268_v32  ;;  %v1374_v2 = vpack.c.bf16 %v184_v11, %v172_v10  ;;  %v1912_v20 = vand.u32 4294901760, %v1595_v35  ;;  %v1913_v11 = vand.u32 4294901760, %v1601_v38 }
  0x36   :  { %1363 = vmatpush1.bf16.msra.mxu0 %v1709_v19  ;;  %1317 = vmatprep.subr.bf16.mxu1 %v1316_v44  ;;  %v264_v44 = vand.u32 4294901760, %v263_v37  ;;  %v1326_v3 = vpack.c.bf16 %v258_v42, %v246_v40  ;;  %v1914_v21 = vand.u32 4294901760, %v1615_v47  ;;  %v1382_v28 = vpack.c.bf16 %v232_v63, %v220_v62 }
  0x37   :  { %1365 = vmatprep.subr.bf16.mxu0 %v1713_v29  ;;  %v270_v60 = vand.u32 4294901760, %v269_v43  ;;  %v1378_v9 = vpack.c.bf16 %v1912_v20, %v1911_v18  ;;  %v1915_v35 = vand.u32 4294901760, %v1629_v53  ;;  %v1916_v13 = vand.u32 4294901760, %v1632_v54 }
  0x38   :  { %v1328_v17 = vpack.c.bf16 %v276_v56, %v264_v44  ;;  %v1380_v22 = vpack.c.bf16 %v1914_v21, %v1913_v11  ;;  %v1917_v38 = vand.u32 4294901760, %v1641_v58  ;;  %v1388_v48 = vpack.c.bf16 %v274_v55, %v262_v61 }
  0x39   :  { %1319 = vmatpush1.bf16.msra.mxu1 %v1318_v59  ;;  %v282_v59 = vand.u32 4294901760, %v281_v50  ;;  %v1384_v23 = vpack.c.bf16 %v1916_v13, %v1915_v35  ;;  %v1390_v49 = vpack.c.bf16 %v280_v31, %v268_v32  ;;  %v1473_v53 = vmov 0   ;;  %v781_v31 = vld [vmem:[%s1897_s0] sm:$0xff] }
  0x3a   :  { %1367 = vmatpush1.bf16.msra.mxu0 %v1725_v39  ;;  %1321 = vmatprep.subr.bf16.mxu1 %v1320_v14  ;;  %v1386_v47 = vpack.c.bf16 %v1917_v38, %v244_v46  ;;  %v54_v58 = vlaneseq  ;;  %vm788_vm2 = vcmask 64512  }
  0x3b   :  { %1369 = vmatprep.subr.bf16.mxu0 %v1743_v45  ;;  %v1330_v10 = vpack.c.bf16 %v282_v59, %v270_v60  ;;  %1440 = vset.pattern.permute.xlu0 %v1473_v53 }
  0x3c   :  { %v780_v55 = vand.u32 127, %v54_v58 }
  0x3d   :  { %1323 = vmatpush1.bf16.msra.mxu1 %v1322_v51 }
  0x3e   :  { %1371 = vmatpush1.bf16.msra.mxu0 %v1746_v52  ;;  %1325 = vmatprep.subr.bf16.mxu1 %v1324_v24 }
  0x3f   :  { %1373 = vmatprep.subr.bf16.mxu0 %v1372_v15 }
  0x41   :  { %537 = vmatmul.mubr.f32.vlgmr.msra.gmra.mrb[0].mxu0 %v1910_v8  ;;  %1327 = vmatpush1.bf16.msra.mxu1 %v1326_v3 }
  0x42   :  { %1375 = vmatpush1.bf16.msra.mxu0 %v1374_v2  ;;  %1329 = vmatprep.subr.bf16.mxu1 %v1328_v17 }
  0x43   :  { %1377 = vmatprep.subr.bf16.mxu0 %v1376_v16  ;;  %667 = vmatprep.mubr.f32.mxu0 %v1472_v0 }
  0x45   :  { %1331 = vmatpush1.bf16.msra.mxu1 %v1330_v10 }
  0x46   :  { %1379 = vmatpush1.bf16.msra.mxu0 %v1378_v9  ;;  %1262 = vmatprep.subr.mxu1 %v1472_v0 }
  0x47   :  { %1381 = vmatprep.subr.bf16.mxu0 %v1380_v22 }
  0x48   :  { %330 = vmatmul.mubr.f32.vlgmr.msra.gmra.mrb[0].mxu1 %v1688_v4 }
  0x49   :  { %1264 = vmatprep.mubr.msk.f32.mxu1 %vm1474_vm1, %v1472_v0 }
  0x4a   :  { %1383 = vmatpush1.bf16.msra.mxu0 %v1382_v28 }
  0x4b   :  { %1385 = vmatprep.subr.bf16.mxu0 %v1384_v23 }
  0x4e   :  { %1387 = vmatpush1.bf16.msra.mxu0 %v1386_v47 }
  0x4f   :  { %1389 = vmatprep.subr.bf16.mxu0 %v1388_v48 }
  0x52   :  { %1391 = vmatpush1.bf16.msra.mxu0 %v1390_v49 }
  0x53   :  { %1393 = vmatprep.subr.bf16.mxu0 %v1663_v25  ;;  %v55_v25 = vshrl.u32 %v54_v58, 7 }
  0x55   :  { %669 = vmatmul.mubr.f32.vlgmr.msra.gmra.mrb[0].mxu0 %v1688_v4 }
  0x56   :  { %1395 = vmatpush1.bf16.msra.mxu0 %v1669_v26  ;;  %759 = vmatprep.mubr.f32.mxu0 %v1472_v0  ;;  %v56_v26 = vsub.s32 0, %v55_v25 }
  0x57   :  { %1397 = vmatprep.subr.bf16.mxu0 %v1676_v30  ;;  %v52_v30 = vld [vmem:[%s1900_s3] sm:$0x3] }
  0x5a   :  { %1399 = vmatpush1.bf16.msra.mxu0 %v1692_v5  ;;  %v60_v5 = vsub.s32 1, %v55_v25 }
  0x5b   :  { %1401 = vmatprep.subr.bf16.mxu0 %v1697_v7  ;;  %v57_v7 = vrot.slane %v52_v30, %v56_v26 }
  0x5e   :  { %1403 = vmatpush1.bf16.msra.mxu0 %v1709_v19  ;;  %v61_v19 = vrot.slane %v52_v30, %v60_v5 }
  0x5f   :  { %1405 = vmatprep.subr.bf16.mxu0 %v1713_v29 }
  0x62   :  { %1407 = vmatpush1.bf16.msra.mxu0 %v1725_v39 }
  0x63   :  { %1409 = vmatprep.subr.bf16.mxu0 %v1743_v45 }
  0x66   :  { %1411 = vmatpush1.bf16.msra.mxu0 %v1746_v52 }
  0x69   :  { %761 = vmatmul.mubr.f32.vlgmr.msra.gmra.mrb[0].mxu0 %v1688_v4 }
 0x11b   :  { %v331_v54 = vpop.f32.mrb[0].mxu1 }
 0x11c   :  { %v333_v57 = vpop.f32.mrb[1].mxu1  ;;  %v1412_v29 = vadd.f32 %v331_v54, %v57_v7 }
 0x11d   :  { %v1414_v33 = vadd.f32 %v333_v57, %v61_v19 }
 0x13c   :  { %v762_v39 = vpop.f32.mrb[0].mxu0 }
 0x13d   :  { %v1413_v45 = vadd.f32 %v1412_v29, %v762_v39  ;;  %v764_v52 = vpop.f32.mrb[1].mxu0 }
 0x13e   :  { %v1415_v4 = vadd.f32 %v1414_v33, %v764_v52 }
 0x13f   :  { %v767_v62 = vmul.f32 %v1413_v45, %v1413_v45 }
 0x140   :  { %v772_v63 = vmul.f32 %v1415_v4, %v1415_v4 }
 0x141   :  { %768 = vadd.xlane.f32.xlu1 %v767_v62 }
 0x142   :  { %773 = vadd.xlane.f32.xlu0 %v772_v63 }
 0x158   :  { %783 = vperm.xlu0 %1440, %v781_v31  }
 0x1ce   :  { %v769_v32 = vpop.xlane.xlu1 %768 }
 0x1cf   :  { %v770_v46 = vmax.f32 %v769_v32, 1e-24  ;;  %v774_v50 = vpop.xlane.xlu0 %773 }
 0x1d0   :  { %v775_v61 = vmax.f32 %v774_v50, 1e-24 }
 0x1d1   :  { %1441 = vrsqrt.f32 %v770_v46 }
 0x1d2   :  { %1443 = vrsqrt.f32 %v775_v61 }
 0x1d7   :  { %v784_v14 = vpop.permute.xlu0 %783 }
 0x1d8   :  { %vm785_vm3 = vcmp.eq.s32.totalorder %v780_v55, %v784_v14 }
 0x1d9   :  { %v1246_v27 = vsel %vm785_vm3, 1.0, %v1472_v0 }
 0x1da   :  { %v790_v1 = vsel %vm788_vm2, %v1246_v27, 0 }
 0x1db   :  { %v1442_v6 = vpop.eup %1441  ;;  %v859_v12 = vsub.f32 %v790_v1, %v790_v1 }
 0x1dc   :  { %v1444_v34 = vpop.eup %1443  ;;  %v777_v36 = vmul.f32 %v1442_v6, %v1413_v45 }
 0x1dd   :  { %v778_v37 = vmul.f32 %v1444_v34, %v1415_v4  ;;  %v860_v41 = vand.u32 4294901760, %v859_v12 }
 0x1de   :  { %1238 = vst [vmem:[%s1901_s4] sm:$0xff] %v777_v36 }
 0x1df   :  { %v793_v51 = vand.u32 4294901760, %v778_v37  ;;  %1239 = vst [vmem:[%s1901_s4 + $0x8] sm:$0xff] %v778_v37  ;;  %v861_v40 = vsub.f32 %v859_v12, %v860_v41 }
 0x1e1   :  { %1263 = vmatpush3.msra.mxu1 %v793_v51  ;;  %v862_v42 = vand.u32 4294901760, %v861_v40  ;;  %v870_v43 = vsub.f32 %v778_v37, %v793_v51 }
 0x1e2   :  { %1267 = vmatprep.subr.mxu1 %v1472_v0 }
 0x1e3   :  { %1265 = vmatmul.mubr.f32.vlgmr.msra.gmra.mrb[2].mxu1 %v862_v42  ;;  %v871_v15 = vand.u32 4294901760, %v870_v43 }
 0x1e4   :  { %1269 = vmatprep.mubr.msk.f32.mxu1 %vm1474_vm1, %v1472_v0 }
 0x1e5   :  { %v872_v24 = vsub.f32 %v870_v43, %v871_v15 }
 0x1e7   :  { %v873_v44 = vand.u32 4294901760, %v872_v24 }
 0x1e9   :  { %1268 = vmatpush3.msra.mxu1 %v873_v44 }
 0x1ea   :  { %1272 = vmatprep.subr.mxu1 %v1472_v0 }
 0x1eb   :  { %1270 = vmatmul.mubr.msk.f32.vlgmr.msra.gmra.mrb[2].mxu1 %vm788_vm2, %v1246_v27 }
 0x1ec   :  { %1273 = vmatpush3.msra.mxu1 %v870_v43  ;;  %1274 = vmatprep.mubr.msk.f32.mxu1 %vm1474_vm1, %v1472_v0 }
 0x1ed   :  { %1277 = vmatprep.subr.mxu1 %v1472_v0 }
 0x1f3   :  { %1275 = vmatmul.mubr.f32.vlgmr.msra.gmra.mrb[2].mxu1 %v859_v12 }
 0x1f4   :  { %1278 = vmatpush3.msra.mxu1 %v793_v51  ;;  %1279 = vmatprep.mubr.msk.f32.mxu1 %vm1474_vm1, %v1472_v0 }
 0x1f5   :  { %1282 = vmatprep.subr.mxu1 %v1472_v0 }
 0x1fb   :  { %1280 = vmatmul.mubr.f32.vlgmr.msra.gmra.mrb[2].mxu1 %v860_v41 }
 0x1fc   :  { %1283 = vmatpush3.msra.mxu1 %v871_v15  ;;  %1284 = vmatprep.mubr.msk.f32.mxu1 %vm1474_vm1, %v1472_v0 }
 0x1fd   :  { %1287 = vmatprep.subr.mxu1 %v1472_v0 }
 0x203   :  { %1285 = vmatmul.mubr.msk.f32.vlgmr.msra.gmra.mrb[2].mxu1 %vm788_vm2, %v1246_v27 }
 0x204   :  { %1288 = vmatpush3.msra.mxu1 %v793_v51  ;;  %1289 = vmatprep.mubr.msk.f32.mxu1 %vm1474_vm1, %v1472_v0 }
 0x20b   :  { %1290 = vmatmul.mubr.msk.f32.vlgmr.msra.gmra.mrb[2].mxu1 %vm788_vm2, %v1246_v27 }
 0x2de   :  { %v1234_v56 = vpop.f32.mrb[2].mxu1 }
 0x2df   :  { %1240 = vst [vmem:[%s1901_s4 + $0x10] sm:$0xff] %v1234_v56  ;;  %v1291_v2 = vpop.f32.mrb[3].mxu1 }
 0x2e0   :  { %1245 = vsyncpa [#allocation3], 1 }

</bundles_post_ra>
